<compile_context>
chip_gen: v7x
topology: tpu7x:2x2x1
jax: 0.10.0
libtpu: 0.0.40
codegen_flags: <defaults>
</compile_context>

<pallas_src>
import math
import functools

import jax
import jax.numpy as jnp
from jax import lax
from jax.experimental import pallas as pl
from jax.experimental.pallas import tpu as pltpu


def _round_up(x, m):
    return ((x + m - 1) // m) * m


def _cdiv(a, b):
    return (a + b - 1) // b


def make_cosnorm_kernel(scale, compute_dtype, eps=1e-12):
    scale = float(scale)

    def kernel(x_ref, w_ref, o_ref):
        # ---- x side: row_scale = scale / (1 + ||x_row||), f32 ---------------
        x = x_ref[...]
        x32 = x.astype(jnp.float32)
        norm_x = jnp.sqrt(jnp.sum(x32 * x32, axis=1, keepdims=True))   # (TM, 1)
        denom = 1.0 + norm_x
        inv = pl.reciprocal(denom, approx=True)      # EUP fast path (per-row)
        inv = inv * (2.0 - denom * inv)              # one Newton step -> ~f32
        row_scale = scale * inv                      # (TM, 1)

        # ---- weight side: fold 1/||w_row|| into the MXU-operand cast --------
        # No persistent scratch; the (TN, K) multiply fuses with the dtype cast
        # the MXU needs anyway and its VPU cost is ~1/TM of the MXU work.
        w32 = w_ref[...].astype(jnp.float32)
        inv_w = lax.rsqrt(jnp.sum(w32 * w32, axis=1, keepdims=True) + eps)
        w_op = (w32 * inv_w).astype(compute_dtype)   # (TN, K)

        # ---- matmul on raw (cast) x, contracting the last dim of both -------
        acc = lax.dot_general(
            x.astype(compute_dtype), w_op,
            dimension_numbers=(((1,), (1,)), ((), ())),
            preferred_element_type=jnp.float32,
        )                                            # (TM, TN) f32

        # ---- cheap (TM, TN) row-scale instead of a (TM, K) scaled copy ------
        o_ref[...] = (acc * row_scale).astype(o_ref.dtype)

    return kernel


def _pick_tiles(B, K, out_dims, tm, tn, x_bytes, w_bytes, c_bytes):
    # Output tile width: full head if it fits (no padding at all), else a
    # lane-dense multiple of 128 (unmasked vst except on the ragged last tile).
    if out_dims <= tn:
        TN = out_dims
    else:
        TN = max(128, (tn // 128) * 128)

    # Batch tile: balance B over cdiv(B, tm) tiles so mid-size batches do not
    # pad up to a full tile; multiple of 8 (sublanes) or the full batch.
    if B <= tm:
        TM = B
    else:
        n_bt = _cdiv(B, tm)
        TM = _round_up(_cdiv(B, n_bt), 8)

    # Keep double-buffered inputs + output + transient operand casts within a
    # budget that fits every generation once the scoped limit is raised.
    # TODO(synk): in_dims (K) is kept whole per block; extremely large K would
    # need K-tiling (accumulate sumsq + matmul over K blocks, scale at the end).
    def vmem_est(tm_, tn_):
        return (2 * tm_ * K * x_bytes            # x (double-buffered)
                + 2 * tn_ * K * w_bytes          # weight (double-buffered)
                + 2 * tm_ * tn_ * 4              # output (f32)
                + (tm_ + tn_) * K * c_bytes)     # transient MXU operand casts

    budget = 20 * 1024 * 1024
    while vmem_est(TM, TN) > budget and (TM > 8 or TN > 128):
        if TM > 8:                               # shrink TM before TN (v5e note)
            TM = max(8, _round_up(TM // 2, 8))
        else:
            TN = max(128, ((TN // 2) // 128) * 128)
    return TM, TN


@functools.partial(jax.jit, static_argnames=("scale", "compute_dtype", "tm", "tn"))
def cosnorm_classifier(x, weight, *, scale=16, compute_dtype=jnp.bfloat16,
                       tm=256, tn=256):
    """x: (B, in_dims), weight: (out_dims, in_dims) -> (B, out_dims) f32.

    compute_dtype only affects the MXU operands (accumulation and all norm math
    stay f32). Default bf16 gives 2-4x MXU throughput on v5e/v6e/v7x; pass
    jnp.float32 for a bit-tighter result.
    """
    B, in_dims = x.shape
    out_dims, in_dims_w = weight.shape
    assert in_dims == in_dims_w

    c_bytes = jnp.dtype(compute_dtype).itemsize
    TM, TN = _pick_tiles(B, in_dims, out_dims, tm, tn,
                         x.dtype.itemsize, weight.dtype.itemsize, c_bytes)

    grid = (_cdiv(B, TM), _cdiv(out_dims, TN))   # (batch tiles, out tiles)

    return pl.pallas_call(
        make_cosnorm_kernel(scale, compute_dtype),
        out_shape=jax.ShapeDtypeStruct((B, out_dims), jnp.float32),
        grid=grid,
        in_specs=[
            # x block index depends only on the outer (batch) axis -> the
            # pipeline elides its re-DMA across the whole inner out sweep.
            pl.BlockSpec((TM, in_dims), lambda i, j: (i, 0)),
            # weight streams along the inner axis (the dominant HBM traffic).
            pl.BlockSpec((TN, in_dims), lambda i, j: (j, 0)),
        ],
        out_specs=pl.BlockSpec((TM, TN), lambda i, j: (i, j)),
        compiler_params=pltpu.CompilerParams(
            # No cross-step state -> both axes are independent; v7x megacore
            # can split either one. Single-core chips ignore this.
            dimension_semantics=("parallel", "parallel"),
            vmem_limit_bytes=32 * 1024 * 1024,
        ),
        cost_estimate=pl.CostEstimate(
            flops=2 * B * in_dims * out_dims,
            bytes_accessed=(B * in_dims * x.dtype.itemsize
                            + grid[0] * out_dims * in_dims * weight.dtype.itemsize
                            + B * out_dims * 4),
            transcendentals=grid[1] * B + grid[0] * out_dims,
        ),
    )(x, weight)


def reference(x, weight, scale=16):
    norm_x = jnp.linalg.norm(x, axis=1, keepdims=True)
    ex = norm_x / (1.0 + norm_x) * (x / norm_x)
    ew = weight / jnp.linalg.norm(weight, axis=1, keepdims=True)
    return (scale * ex) @ ew.T


if __name__ == "__main__":
    key = jax.random.PRNGKey(0)
    scale = 16

    configs = [
        (8, 32, 16),     # single aligned tile
        (13, 40, 30),    # non-multiple-of-8 batch -> full-dim blocks, no padding
        (20, 64, 300),   # out_dims > TN -> multiple out tiles + ragged edge tile
    ]

    for i, (batch, in_dims, out_dims) in enumerate(configs):
        kx, kw = jax.random.split(jax.random.fold_in(key, i))
        # Deterministic init mirroring reset_parameters(): uniform(-stdv, stdv).
        stdv = 1.0 / math.sqrt(in_dims)
        weight = jax.random.uniform(
            kw, (out_dims, in_dims), minval=-stdv, maxval=stdv, dtype=jnp.float32
        )
        x = jax.random.normal(kx, (batch, in_dims), dtype=jnp.float32)

        ref = reference(x, weight, scale=scale)

        # f32 MXU path: tight check.
        # NOTE: reference yields NaN for all-zero x / weight rows (0/0); this
        # kernel yields finite values there (intended deviation, as before).
        out_f32 = jax.block_until_ready(
            cosnorm_classifier(x, weight, scale=scale, compute_dtype=jnp.float32)
        )
        assert out_f32.shape == (batch, out_dims)
        assert jnp.allclose(out_f32, ref, atol=2e-3, rtol=2e-3), (
            f"f32 mismatch at config {(batch, in_dims, out_dims)}: "
            f"max abs err = {float(jnp.max(jnp.abs(out_f32 - ref)))}"
        )

        # Default bf16-MXU path (f32 accumulation): looser check.
        out_bf16 = jax.block_until_ready(
            cosnorm_classifier(x, weight, scale=scale)
        )
        assert out_bf16.shape == (batch, out_dims)
        assert jnp.allclose(out_bf16, ref, atol=1e-1, rtol=2e-2), (
            f"bf16 mismatch at config {(batch, in_dims, out_dims)}: "
            f"max abs err = {float(jnp.max(jnp.abs(out_bf16 - ref)))}"
        )

    print("KERNEL_OK")
</pallas_src>

<mosaic_0001>
module attributes {stable_mosaic.version = 11 : i64} {
  func.func @kernel(%arg0: i32, %arg1: i32, %arg2: memref<8x32xf32, #tpu.memory_space<vmem>>, %arg3: memref<16x32xf32, #tpu.memory_space<vmem>>, %arg4: memref<8x16xf32, #tpu.memory_space<vmem>>) attributes {dimension_semantics = [#tpu.dimension_semantics<parallel>, #tpu.dimension_semantics<parallel>], iteration_bounds = array<i64: 1, 1>, scalar_prefetch = 0 : i64, scratch_operands = 0 : i64, tpu.core_type = #tpu.core_type<tc>, window_params = [{transform_indices = @transform_0, window_bounds = array<i64: 8, 32>}, {transform_indices = @transform_1, window_bounds = array<i64: 16, 32>}, {transform_indices = @transform_2, window_bounds = array<i64: 8, 16>}]} {
    %c0 = arith.constant 0 : index
    %c0_0 = arith.constant 0 : index
    %0 = vector.load %arg2[%c0, %c0_0] : memref<8x32xf32, #tpu.memory_space<vmem>>, vector<8x32xf32>
    %1 = arith.mulf %0, %0 : vector<8x32xf32>
    %cst = arith.constant dense<0.000000e+00> : vector<8xf32>
    %2 = vector.multi_reduction <add>, %1, %cst [1] : vector<8x32xf32> to vector<8xf32>
    %3 = vector.shape_cast %2 : vector<8xf32> to vector<8x1xf32>
    %4 = math.sqrt %3 : vector<8x1xf32>
    %cst_1 = arith.constant 1.000000e+00 : f32
    %5 = vector.broadcast %cst_1 : f32 to vector<8x1xf32>
    %6 = arith.addf %5, %4 : vector<8x1xf32>
    %7 = tpu.reciprocal %6 {approx = true} : vector<8x1xf32> -> vector<8x1xf32>
    %8 = arith.mulf %6, %7 : vector<8x1xf32>
    %cst_2 = arith.constant 2.000000e+00 : f32
    %9 = vector.broadcast %cst_2 : f32 to vector<8x1xf32>
    %10 = arith.subf %9, %8 : vector<8x1xf32>
    %11 = arith.mulf %7, %10 : vector<8x1xf32>
    %cst_3 = arith.constant 1.600000e+01 : f32
    %12 = vector.broadcast %cst_3 : f32 to vector<8x1xf32>
    %13 = arith.mulf %12, %11 : vector<8x1xf32>
    %c0_4 = arith.constant 0 : index
    %c0_5 = arith.constant 0 : index
    %14 = vector.load %arg3[%c0_4, %c0_5] : memref<16x32xf32, #tpu.memory_space<vmem>>, vector<16x32xf32>
    %15 = arith.mulf %14, %14 : vector<16x32xf32>
    %cst_6 = arith.constant dense<0.000000e+00> : vector<16xf32>
    %16 = vector.multi_reduction <add>, %15, %cst_6 [1] : vector<16x32xf32> to vector<16xf32>
    %17 = vector.shape_cast %16 : vector<16xf32> to vector<16x1xf32>
    %cst_7 = arith.constant 9.99999996E-13 : f32
    %18 = vector.broadcast %cst_7 : f32 to vector<16x1xf32>
    %19 = arith.addf %17, %18 : vector<16x1xf32>
    %20 = math.rsqrt %19 : vector<16x1xf32>
    %21 = vector.broadcast %20 : vector<16x1xf32> to vector<16x32xf32>
    %22 = arith.mulf %14, %21 : vector<16x32xf32>
    %cst_8 = arith.constant dense<0.000000e+00> : vector<8x16xf32>
    %23 = tpu.matmul %0, %22, %cst_8 {dimension_numbers = #tpu.dot_dimension_numbers<[1], [1], [0], [0], [0, 0, 1, 0], [], []>} : vector<8x32xf32>, vector<16x32xf32>, vector<8x16xf32> -> vector<8x16xf32>
    %24 = vector.broadcast %13 : vector<8x1xf32> to vector<8x16xf32>
    %25 = arith.mulf %23, %24 : vector<8x16xf32>
    %c0_9 = arith.constant 0 : index
    %c0_10 = arith.constant 0 : index
    %26 = vector.load %arg4[%c0_9, %c0_10] : memref<8x16xf32, #tpu.memory_space<vmem>>, vector<8x16xf32>
    tpu.vector_store %arg4[%c0_9, %c0_10], %25 {strides = array<i32>} : memref<8x16xf32, #tpu.memory_space<vmem>>, vector<8x16xf32>,
    return
  }
  func.func @transform_0(%arg0: i32, %arg1: i32) -> (i32, i32) {
    %c0_i32 = arith.constant 0 : i32
    %c0_i32_0 = arith.constant 0 : i32
    return %arg0, %c0_i32 : i32, i32
  }
  func.func @transform_1(%arg0: i32, %arg1: i32) -> (i32, i32) {
    %c0_i32 = arith.constant 0 : i32
    %c0_i32_0 = arith.constant 0 : i32
    return %arg1, %c0_i32 : i32, i32
  }
  func.func @transform_2(%arg0: i32, %arg1: i32) -> (i32, i32) {
    %c0_i32 = arith.constant 0 : i32
    return %arg0, %arg1 : i32, i32
  }
}

</mosaic_0001>

<bundles_post_ra>
// kernel: cosnorm_classifier.1
= control target key start
LH: loop header
LB: loop body
LE: loop exit
PB: predicated region body
PF: predicated region fallthrough
CT: control target
= control target key end

     0   :  { %7 = vsyncpa [#allocation3], 0  ;;  %s348_s0 = inlined_call_operand.hbm [shape: f32[8,32], index: 0, kind: input, shape index: {}]   ;;  %s349_s1 = inlined_call_operand.hbm [shape: f32[16,32], index: 1, kind: input, shape index: {}]   ;;  %s350_s2 = inlined_call_operand.hbm [shape: f32[8,16], index: 2, kind: output, shape index: {}]  }
   0x1   :  { %8 = vsyncpa [#allocation6], 0 }
   0x2   :  { %9 = vsyncpa [#allocation4], 0  ;;  %s276_s9 = smov [#allocation2]   ;;  %s277_s11 = smov [#allocation5]  }
   0x3   :  { %s16_s10 = sshll.u32 %s276_s9, 4  ;;  %s25_s12 = sshll.u32 %s277_s11, 4  ;;  %s17_s10 = int_to_ptr.vmem [resolvable:$true] %s16_s10  ;;  %s299_s12 = int_to_ptr.vmem [resolvable:$true] %s25_s12 }
   0x4   :  { %s204_s15 = scalar_lea.hbm %s348_s0, 128 }
   0x5   :  { %p205_p0 = scmp.ne.s32.totalorder %s348_s0, %s204_s15  ;;  %p208_p1 = scmp.lt.u32.totalorder %s204_s15, %s348_s0 }
   0x7   :  { %p210_p2 = pnand %p208_p1, %p205_p0 }
   0x9   :  { %213 = shalt.err (!%p210_p2)
}
   0xa   :  { %s214_s20 = scalar_lea.vmem %s17_s10, 128  ;;  %p219_p4 = scmp.lt.s32.totalorder %s17_s10, %s17_s10 }
   0xb   :  { %p215_p3 = scmp.ne.s32.totalorder %s17_s10, %s214_s20  ;;  %p220_p5 = scmp.lt.s32.totalorder %s214_s20, %s214_s20 }
   0xd   :  { %p221_p6 = por %p220_p5, %p219_p4 }
   0xf   :  { %p222_p7 = pnand %p221_p6, %p215_p3 }
  0x11   :  { %225 = shalt.err (!%p222_p7)
}
  0x12   :  { %19 = dma.hbm_to_vmem [thread:$0]  %s348_s0, 128, %s17_s10, [#allocation3]  }
  0x13   :  { %s226_s25 = scalar_lea.hbm %s349_s1, 256 }
  0x14   :  { %p227_p8 = scmp.ne.s32.totalorder %s349_s1, %s226_s25  ;;  %p230_p9 = scmp.lt.u32.totalorder %s226_s25, %s349_s1 }
  0x16   :  { %p232_p10 = pnand %p230_p9, %p227_p8 }
  0x18   :  { %235 = shalt.err (!%p232_p10)
}
  0x19   :  { %s236_s30 = scalar_lea.vmem %s299_s12, 256  ;;  %p241_p12 = scmp.lt.s32.totalorder %s299_s12, %s299_s12 }
  0x1a   :  { %p237_p11 = scmp.ne.s32.totalorder %s299_s12, %s236_s30  ;;  %p242_p13 = scmp.lt.s32.totalorder %s236_s30, %s236_s30 }
  0x1c   :  { %p243_p0 = por %p242_p13, %p241_p12 }
  0x1e   :  { %p244_p1 = pnand %p243_p0, %p237_p11 }
  0x20   :  { %247 = shalt.err (!%p244_p1)
}
  0x21   :  { %s278_s0 = smov 128   ;;  %s279_s3 = smov 8  }
  0x22   :  { %31 = dma.hbm_to_vmem [thread:$0]  %s349_s1, 256, %s299_s12, [#allocation6], %s278_s0, %s278_s0, %s279_s3  }
  0x23   :  { %270 = dma.done.wait [#allocation3], 128  }
  0x24   :  { %271 = vsyncadd [#allocation3], 4294967168 }
  0x25   :  { %272 = dma.done.wait [#allocation6], 256  }
  0x26   :  { %273 = vsyncadd [#allocation6], 4294967040  ;;  %vm40_vm0 = vcmask 261120   ;;  %v57_v0 = vld [vmem:[#allocation5] sm:$0xff]  ;;  %v58_v1 = vld [vmem:[#allocation5 + $0x8] sm:$0xff]  ;;  %v280_v6 = vmov 0.0|0.0  }
  0x27   :  { %v59_v2 = vmul.f32 %v57_v0, %v57_v0  ;;  %v60_v3 = vmul.f32 %v58_v1, %v58_v1  ;;  %184 = vmatprep.subr.bf16.mxu0 %v280_v6  ;;  %vm281_vm1 = vmmov 0   ;;  %v282_v7 = vmov 0.0   ;;  %v38_v8 = vld [vmem:[#allocation2] sm:$0xff]  ;;  %vm186_vm2 = vmpackc.low %vm40_vm0, %vm40_vm0  ;;  %s283_s1 = smov [#allocation7]  }
  0x28   :  { %181 = vmatprep.mubr.msk.f32.mxu0 %vm281_vm1, %v282_v7  ;;  %v39_v9 = vmul.f32 %v38_v8, %v38_v8  ;;  %s161_s6 = sshll.u32 %s283_s1, 4  ;;  %vm153_vm5 = vcmask 130048   ;;  %s162_s6 = int_to_ptr.vmem [resolvable:$true] %s161_s6 }
  0x29   :  { %v61_v4 = vsel %vm40_vm0, %v59_v2, 0.0  ;;  %v64_v5 = vsel %vm40_vm0, %v60_v3, 0.0  ;;  %s248_s7 = scalar_lea.vmem %s162_s6, 128  ;;  %p253_p3 = scmp.lt.s32.totalorder %s162_s6, %s162_s6 }
  0x2a   :  { %62 = vadd.xlane.f32.xlu0 %v61_v4  ;;  %v41_v10 = vsel %vm40_vm0, %v39_v9, 0.0  ;;  %p249_p2 = scmp.ne.s32.totalorder %s162_s6, %s248_s7  ;;  %p254_p4 = scmp.lt.s32.totalorder %s248_s7, %s248_s7 }
  0x2b   :  { %42 = vadd.xlane.f32.xlu1 %v41_v10 }
  0x2c   :  { %p255_p5 = por %p254_p4, %p253_p3 }
  0x2e   :  { %65 = vadd.xlane.f32.xlu0 %v64_v5  ;;  %p256_p6 = pnand %p255_p5, %p249_p2 }
  0xb7   :  { %v63_v11 = vpop.xlane.xlu0 %62 }
  0xb8   :  { %v67_v12 = vadd.f32 1e-12, %v63_v11  ;;  %v43_v20 = vpop.xlane.xlu1 %42 }
  0xb9   :  { %vm46_vm3 = vcmp.eq.f32.partialorder %v43_v20, inf  ;;  %v49_v23 = vand.u32 2147483648, %v43_v20  ;;  %vm48_vm4 = vcmp.eq.f32.partialorder %v43_v20, 0.0 }
  0xba   :  { %196 = vrsqrt.f32 %v67_v12 }
  0xbb   :  { %v66_v13 = vpop.xlane.xlu0 %65 }
  0xbc   :  { %v68_v14 = vadd.f32 1e-12, %v66_v13 }
  0xbe   :  { %198 = vrsqrt.f32 %v68_v14 }
  0xbf   :  { %200 = vrsqrt.f32 %v43_v20 }
  0xc4   :  { %v197_v15 = vpop.eup %196 }
  0xc5   :  { %v71_v17 = vmul.f32 %v197_v15, %v57_v0 }
  0xc8   :  { %v199_v16 = vpop.eup %198 }
  0xc9   :  { %v72_v18 = vmul.f32 %v199_v16, %v58_v1  ;;  %v201_v21 = vpop.eup %200 }
  0xca   :  { %v45_v22 = vmul.f32 %v201_v21, %v43_v20 }
  0xcb   :  { %v185_v19 = vpack.c.bf16 %v72_v18, %v71_v17 }
  0xcc   :  { %v47_v24 = vsel %vm46_vm3, %v43_v20, %v45_v22 }
  0xcd   :  { %187 = vmatpush3.bf16.xpose.msk.msra.mxu0 %vm186_vm2, %v185_v19  ;;  %v50_v25 = vsel %vm48_vm4, %v49_v23, %v47_v24 }
  0xce   :  { %v51_v26 = vadd.f32 1.0, %v50_v25 }
  0xd0   :  { %202 = vrcp.f32 %v51_v26 }
  0xd4   :  { %182 = vmatmul.mubr.msk.f32.vlgmr.msra.gmra.mrb[0].mxu0 %vm40_vm0, %v38_v8 }
  0xda   :  { %v203_v27 = vpop.eup %202 }
  0xdb   :  { %v53_v28 = vmul.f32 %v203_v27, %v51_v26 }
  0xdd   :  { %v54_v29 = vsub.f32 2.0, %v53_v28 }
  0xdf   :  { %v55_v30 = vmul.f32 %v203_v27, %v54_v29 }
  0xe1   :  { %v56_v31 = vmul.f32 16.0, %v55_v30 }
 0x1a7   :  { %v148_v32 = vpop.f32.mrb[0].mxu0 }
 0x1a8   :  { %v152_v33 = vmul.f32 %v148_v32, %v56_v31  ;;  %v183_v34 = vpop.f32.mrb[1].mxu0 }
 0x1aa   :  { %154 = vst.msk [vmem:[#allocation7] sm:$0xff] %vm153_vm5, %v152_v33 }
 0x1ab   :  { %259 = shalt.err (!%p256_p6)
}
 0x1ac   :  { %s260_s10 = scalar_lea.hbm %s350_s2, 128 }
 0x1ad   :  { %p261_p7 = scmp.ne.s32.totalorder %s350_s2, %s260_s10  ;;  %p264_p8 = scmp.lt.u32.totalorder %s260_s10, %s350_s2 }
 0x1af   :  { %p266_p9 = pnand %p264_p8, %p261_p7 }
 0x1b1   :  { %269 = shalt.err (!%p266_p9)
}
 0x1b2   :  { %164 = dma.vmem_to_hbm [thread:$0]  %s162_s6, 128, %s350_s2, [#allocation4]  }
 0x1b3   :  { %274 = dma.done.wait [#allocation4], 128  }
 0x1b4   :  { %275 = vsyncadd [#allocation4], 4294967168 }
 0x1b5   :  { %168 = vsyncpa [#allocation3], 1 }
 0x1b6   :  { %169 = vsyncpa [#allocation6], 1 }
 0x1b7   :  { %170 = vsyncpa [#allocation4], 1 }

</bundles_post_ra>
